<compile_context>
chip_gen: v7x
topology: tpu7x:2x2x1
jax: 0.10.0
libtpu: 0.0.40
codegen_flags: <defaults>
</compile_context>

<pallas_src>
import functools

import jax
import jax.numpy as jnp
import numpy as np
from jax import lax
from jax.experimental import pallas as pl
from jax.experimental.pallas import tpu as pltpu


def _softplus(z):
    # matches torch.nn.functional.softplus (beta=1, threshold=20)
    return jnp.where(z > 20.0, z, jnp.log1p(jnp.exp(jnp.minimum(z, 20.0))))


def s4_kernel(x_ref, wxT_ref, wdtT_ref, bdt_ref, at_ref, ddiag_ref, o_ref,
              ad_scr, bx_scr, h_scr, *, dt_rank, d_hidden, sub_block):
    # Grid: (batch, L-chunk).  h_scr carries the (N, D_in) state across chunks.
    @pl.when(pl.program_id(1) == 0)
    def _():
        h_scr[...] = jnp.zeros_like(h_scr)

    xb = x_ref[0]                        # (TL, D_in) bf16
    xf = xb.astype(jnp.float32)
    wxT = wxT_ref[...]                   # (D_in, dt_rank + 2N) bf16
    wdtT = wdtT_ref[...]                 # (dt_rank, D_in) bf16
    bdt = bdt_ref[...]                   # (1, D_in) f32
    A_t = at_ref[...]                    # (N, D_in) f32  (D_in on lanes)
    d_diag = ddiag_ref[...]              # (1, D_in) f32

    tl = xf.shape[0]

    # MXU projections: bf16 inputs, f32 accumulation.
    bcd = jnp.dot(xb, wxT, preferred_element_type=jnp.float32)     # (TL, proj)
    # TODO(synk): reference assigns `B, C, dt = split([dt_rank, N, N])` but uses
    # them as (dt, B, C); we split by usage so shapes are consistent.
    dt = bcd[:, :dt_rank]                                          # (TL, dt_rank)
    Bm = bcd[:, dt_rank:dt_rank + d_hidden]                        # (TL, N)
    Cm = bcd[:, dt_rank + d_hidden:]                               # (TL, N)
    delta = _softplus(
        jnp.dot(dt.astype(jnp.bfloat16), wdtT,
                preferred_element_type=jnp.float32) + bdt)         # (TL, D_in)

    # Discretize into VMEM scratch with D_in on the lane axis:
    #   Ad[t, n, d] = exp(delta[t, d] * A[d, n])
    #   Bx[t, n, d] = delta[t, d] * x[t, d] * B[t, n]
    dx = delta * xf
    if sub_block >= tl:
        ad_scr[...] = jnp.exp(delta[:, None, :] * A_t[None, :, :])
        bx_scr[...] = dx[:, None, :] * Bm[:, :, None]
    else:
        # Blockwise stores keep the (TS, N, D_in) intermediates in-register.
        for s in range(0, tl, sub_block):
            sl = pl.ds(s, sub_block)
            ad_scr[sl] = jnp.exp(delta[s:s + sub_block][:, None, :]
                                 * A_t[None, :, :])
            bx_scr[sl] = (dx[s:s + sub_block][:, None, :]
                          * Bm[s:s + sub_block][:, :, None])

    # Sequential recurrence: only the minimal elementwise update is serial.
    # h is written back into bx_scr so the C readout vectorizes after the loop.
    def body(i, h):
        h = ad_scr[i] * h + bx_scr[i]    # (N, D_in)
        bx_scr[i] = h
        return h

    h_scr[...] = lax.fori_loop(0, tl, body, h_scr[...], unroll=min(8, tl))

    # Vectorized readout over the whole chunk: y[t, d] = sum_n h[t, n, d]*C[t, n]
    # TODO(synk): reference einsum contracts `x` with C; intended operand is h.
    y = jnp.sum(bx_scr[...] * Cm[:, :, None], axis=1)              # (TL, D_in)

    # Skip connection: y + x * diag(D) (only the diagonal of the (D,D) ones
    # parameter is meaningful).  Lane-dense chunk-wide store.
    o_ref[0] = (y + xf * d_diag).astype(o_ref.dtype)


def _ceil_to(v, m):
    return -(-v // m) * m


def _vmem_limit_bytes(tl, d_in, d_hidden, dt_rank, proj_dim):
    """Rough padded-VMEM estimate -> scoped limit hint (v5e default is 16 MiB)."""
    d_pad = _ceil_to(d_in, 128)
    n_pad = _ceil_to(d_hidden, 8)
    tl_pad = _ceil_to(tl, 8)
    proj_pad = _ceil_to(proj_dim, 128)
    scratch = 4 * (2 * tl * n_pad * d_pad + n_pad * d_pad)          # Ad, Bx, h
    io = 2 * tl_pad * d_pad * (2 + 4)                               # x bf16 + out f32 (2x buf)
    weights = 2 * (_ceil_to(d_in, 16) * proj_pad * 2
                   + _ceil_to(dt_rank, 16) * d_pad * 2
                   + n_pad * d_pad * 4
                   + 2 * 8 * d_pad * 4)
    est = int(1.25 * (scratch + io + weights)) + (8 << 20)
    return max(32 << 20, min(est, 64 << 20))


def s4_forward(x, wx, wdt, bdt, A, D, *, max_chunk=128):
    """x: (B, L, D_in); wx: (dt_rank+2N, D_in); wdt: (D_in, dt_rank);
    bdt: (D_in,); A: (D_in, N); D: (D_in, D_in).  Returns (B, L, D_in) f32."""
    b, l, d_in = x.shape
    proj_dim = wx.shape[0]
    d_hidden = A.shape[1]
    dt_rank = proj_dim - 2 * d_hidden

    # L-chunk size: largest divisor of L not exceeding max_chunk.
    tl = 1
    for cand in range(1, min(l, max_chunk) + 1):
        if l % cand == 0:
            tl = cand
    sub_block = 8 if tl % 8 == 0 else tl

    xb = x.astype(jnp.bfloat16)
    wxT = jnp.asarray(wx.T, jnp.bfloat16)                 # (D_in, proj_dim)
    wdtT = jnp.asarray(wdt.T, jnp.bfloat16)               # (dt_rank, D_in)
    bdt2 = bdt.reshape(1, d_in).astype(jnp.float32)
    a_t = jnp.asarray(A.T, jnp.float32)                   # (N, D_in)
    d_diag = jnp.diagonal(D).reshape(1, d_in).astype(jnp.float32)

    kernel = functools.partial(s4_kernel, dt_rank=dt_rank, d_hidden=d_hidden,
                               sub_block=sub_block)

    # TODO(synk): for v7x-class parts, additionally split the projections into
    # their own matmul pass and tile D_in as a parallel grid axis of the scan
    # (and/or use a chunked Mamba-2-style matmul scan) to shorten the serial
    # chain and fit the 64 MiB VMEM.
    return pl.pallas_call(
        kernel,
        out_shape=jax.ShapeDtypeStruct((b, l, d_in), jnp.float32),
        grid=(b, l // tl),
        in_specs=[
            pl.BlockSpec((1, tl, d_in), lambda i, j: (i, j, 0)),     # x chunk
            pl.BlockSpec((d_in, proj_dim), lambda i, j: (0, 0)),     # x_proj W^T
            pl.BlockSpec((dt_rank, d_in), lambda i, j: (0, 0)),      # dt_proj W^T
            pl.BlockSpec((1, d_in), lambda i, j: (0, 0)),            # dt_proj bias
            pl.BlockSpec((d_hidden, d_in), lambda i, j: (0, 0)),     # A^T
            pl.BlockSpec((1, d_in), lambda i, j: (0, 0)),            # diag(D)
        ],
        out_specs=pl.BlockSpec((1, tl, d_in), lambda i, j: (i, j, 0)),
        scratch_shapes=[
            pltpu.VMEM((tl, d_hidden, d_in), jnp.float32),           # Ad chunk
            pltpu.VMEM((tl, d_hidden, d_in), jnp.float32),           # Bx / h history
            pltpu.VMEM((d_hidden, d_in), jnp.float32),               # carried h
        ],
        compiler_params=pltpu.CompilerParams(
            dimension_semantics=("parallel", "arbitrary"),
            vmem_limit_bytes=_vmem_limit_bytes(tl, d_in, d_hidden,
                                               dt_rank, proj_dim)),
    )(xb, wxT, wdtT, bdt2, a_t, d_diag)


def s4_reference(x, wx, wdt, bdt, A, D):
    """Pure-JAX reference with the same (intended) semantics and the same
    bf16-in / f32-accumulate projection numerics as the kernel."""
    b, l, d_in = x.shape
    d_hidden = A.shape[1]
    dt_rank = wx.shape[0] - 2 * d_hidden
    xb = x.astype(jnp.bfloat16)
    xf = xb.astype(jnp.float32)
    bcd = jnp.einsum('bld,pd->blp', xb, wx.astype(jnp.bfloat16),
                     preferred_element_type=jnp.float32)
    dt = bcd[..., :dt_rank]
    Bm = bcd[..., dt_rank:dt_rank + d_hidden]
    Cm = bcd[..., dt_rank + d_hidden:]
    delta = _softplus(
        jnp.einsum('blr,dr->bld', dt.astype(jnp.bfloat16),
                   wdt.astype(jnp.bfloat16),
                   preferred_element_type=jnp.float32) + bdt)
    Ad = jnp.exp(delta[..., None] * A[None, None])                  # (B,L,D,N)
    Bx = (delta * xf)[..., None] * Bm[:, :, None, :]                # (B,L,D,N)

    def step(h, inp):
        ad_i, bx_i, c_i = inp
        h = ad_i * h + bx_i
        y = jnp.sum(h * c_i[:, None, :], axis=-1)
        return h, y

    h0 = jnp.zeros((b, d_in, d_hidden), jnp.float32)
    _, ys = lax.scan(step, h0,
                     (Ad.transpose(1, 0, 2, 3), Bx.transpose(1, 0, 2, 3),
                      Cm.transpose(1, 0, 2)))
    y = ys.transpose(1, 0, 2)
    return y + xf * jnp.diagonal(D)[None, None, :]


if __name__ == "__main__":
    b, l = 2, 16
    d_in, d_hidden, dt_rank = 8, 16, 4
    proj_dim = 2 * d_hidden + dt_rank

    key = jax.random.PRNGKey(0)
    k_wx, k_wdt, k_bdt, k_x = jax.random.split(key, 4)

    # deterministic parameter init (stands in for the module's __init__)
    wx = jax.random.normal(k_wx, (proj_dim, d_in), jnp.float32) / jnp.sqrt(d_in)
    wdt = jax.random.normal(k_wdt, (d_in, dt_rank), jnp.float32) / jnp.sqrt(dt_rank)
    bdt = jax.random.normal(k_bdt, (d_in,), jnp.float32) * 0.1
    # TODO(synk): triton `generate_a` not given; use deterministic S4D-real init.
    A = -jnp.broadcast_to(jnp.arange(1, d_hidden + 1, dtype=jnp.float32),
                          (d_in, d_hidden)).copy()
    D = jnp.ones((d_in, d_in), jnp.float32)

    x = jax.random.normal(k_x, (b, l, d_in), jnp.float32)

    # max_chunk=8 -> two L-chunks per batch element, exercising the carried-h
    # scratch and the pl.when() reset path.
    out = jax.block_until_ready(s4_forward(x, wx, wdt, bdt, A, D, max_chunk=8))
    ref = jax.block_until_ready(s4_reference(x, wx, wdt, bdt, A, D))
    np.testing.assert_allclose(np.asarray(out), np.asarray(ref),
                               rtol=2e-2, atol=2e-2)
    print("KERNEL_OK")
</pallas_src>

<mosaic_0001>
module attributes {stable_mosaic.version = 11 : i64} {
  func.func @s4_kernel(%arg0: i32, %arg1: i32, %arg2: memref<1x8x8xbf16, #tpu.memory_space<vmem>>, %arg3: memref<8x36xbf16, #tpu.memory_space<vmem>>, %arg4: memref<4x8xbf16, #tpu.memory_space<vmem>>, %arg5: memref<1x8xf32, #tpu.memory_space<vmem>>, %arg6: memref<16x8xf32, #tpu.memory_space<vmem>>, %arg7: memref<1x8xf32, #tpu.memory_space<vmem>>, %arg8: memref<1x8x8xf32, #tpu.memory_space<vmem>>, %arg9: memref<8x16x8xf32, #tpu.memory_space<vmem>>, %arg10: memref<8x16x8xf32, #tpu.memory_space<vmem>>, %arg11: memref<16x8xf32, #tpu.memory_space<vmem>>) attributes {dimension_semantics = [#tpu.dimension_semantics<parallel>, #tpu.dimension_semantics<arbitrary>], iteration_bounds = array<i64: 2, 2>, scalar_prefetch = 0 : i64, scratch_operands = 3 : i64, tpu.core_type = #tpu.core_type<tc>, window_params = [{transform_indices = @transform_0, window_bounds = array<i64: 1, 8, 8>}, {pipeline_mode = #tpu.pipeline_mode<synchronous>, transform_indices = @transform_1, window_bounds = array<i64: 8, 36>}, {pipeline_mode = #tpu.pipeline_mode<synchronous>, transform_indices = @transform_2, window_bounds = array<i64: 4, 8>}, {pipeline_mode = #tpu.pipeline_mode<synchronous>, transform_indices = @transform_3, window_bounds = array<i64: 1, 8>}, {pipeline_mode = #tpu.pipeline_mode<synchronous>, transform_indices = @transform_4, window_bounds = array<i64: 16, 8>}, {pipeline_mode = #tpu.pipeline_mode<synchronous>, transform_indices = @transform_5, window_bounds = array<i64: 1, 8>}, {transform_indices = @transform_6, window_bounds = array<i64: 1, 8, 8>}]} {
    %c0_i32 = arith.constant 0 : i32
    %0 = arith.cmpi eq, %arg1, %c0_i32 : i32
    %1 = arith.extui %0 : i1 to i32
    %c0_i32_0 = arith.constant 0 : i32
    %2 = arith.cmpi ne, %1, %c0_i32_0 : i32
    scf.if %2 {
      %cst_82 = arith.constant 0.000000e+00 : f32
      %149 = vector.broadcast %cst_82 : f32 to vector<16x8xf32>
      %c0_83 = arith.constant 0 : index
      %c0_84 = arith.constant 0 : index
      %150 = vector.load %arg11[%c0_83, %c0_84] : memref<16x8xf32, #tpu.memory_space<vmem>>, vector<16x8xf32>
      tpu.vector_store %arg11[%c0_83, %c0_84], %149 {strides = array<i32>} : memref<16x8xf32, #tpu.memory_space<vmem>>, vector<16x8xf32>,
    } else {
    }
    %c0 = arith.constant 0 : index
    %c0_1 = arith.constant 0 : index
    %c0_2 = arith.constant 0 : index
    %3 = vector.load %arg2[%c0, %c0_1, %c0_2] : memref<1x8x8xbf16, #tpu.memory_space<vmem>>, vector<1x8x8xbf16>
    %4 = vector.shape_cast %3 : vector<1x8x8xbf16> to vector<8x8xbf16>
    %5 = arith.extf %4 : vector<8x8xbf16> to vector<8x8xf32>
    %c0_3 = arith.constant 0 : index
    %c0_4 = arith.constant 0 : index
    %6 = vector.load %arg3[%c0_3, %c0_4] : memref<8x36xbf16, #tpu.memory_space<vmem>>, vector<8x36xbf16>
    %c0_5 = arith.constant 0 : index
    %c0_6 = arith.constant 0 : index
    %7 = vector.load %arg4[%c0_5, %c0_6] : memref<4x8xbf16, #tpu.memory_space<vmem>>, vector<4x8xbf16>
    %c0_7 = arith.constant 0 : index
    %c0_8 = arith.constant 0 : index
    %8 = vector.load %arg5[%c0_7, %c0_8] : memref<1x8xf32, #tpu.memory_space<vmem>>, vector<1x8xf32>
    %c0_9 = arith.constant 0 : index
    %c0_10 = arith.constant 0 : index
    %9 = vector.load %arg6[%c0_9, %c0_10] : memref<16x8xf32, #tpu.memory_space<vmem>>, vector<16x8xf32>
    %c0_11 = arith.constant 0 : index
    %c0_12 = arith.constant 0 : index
    %10 = vector.load %arg7[%c0_11, %c0_12] : memref<1x8xf32, #tpu.memory_space<vmem>>, vector<1x8xf32>
    %cst = arith.constant dense<0.000000e+00> : vector<8x36xf32>
    %11 = tpu.matmul %4, %6, %cst {dimension_numbers = #tpu.dot_dimension_numbers<[1], [0], [0], [1], [0, 0, 1, 1], [], []>} : vector<8x8xbf16>, vector<8x36xbf16>, vector<8x36xf32> -> vector<8x36xf32>
    %12 = vector.extract_strided_slice %11 {offsets = [0, 0], sizes = [8, 4], strides = [1, 1]} : vector<8x36xf32> to vector<8x4xf32>
    %13 = vector.extract_strided_slice %11 {offsets = [0, 4], sizes = [8, 16], strides = [1, 1]} : vector<8x36xf32> to vector<8x16xf32>
    %14 = vector.extract_strided_slice %11 {offsets = [0, 20], sizes = [8, 16], strides = [1, 1]} : vector<8x36xf32> to vector<8x16xf32>
    %15 = arith.truncf %12 : vector<8x4xf32> to vector<8x4xbf16>
    %cst_13 = arith.constant dense<0.000000e+00> : vector<8x8xf32>
    %16 = tpu.matmul %15, %7, %cst_13 {dimension_numbers = #tpu.dot_dimension_numbers<[1], [0], [0], [1], [0, 0, 1, 1], [], []>} : vector<8x4xbf16>, vector<4x8xbf16>, vector<8x8xf32> -> vector<8x8xf32>
    %17 = vector.broadcast %8 : vector<1x8xf32> to vector<8x8xf32>
    %18 = arith.addf %16, %17 : vector<8x8xf32>
    %cst_14 = arith.constant 2.000000e+01 : f32
    %19 = vector.broadcast %cst_14 : f32 to vector<8x8xf32>
    %20 = arith.cmpf ogt, %18, %19 : vector<8x8xf32>
    %cst_15 = arith.constant 2.000000e+01 : f32
    %21 = vector.broadcast %cst_15 : f32 to vector<8x8xf32>
    %22 = arith.minimumf %18, %21 : vector<8x8xf32>
    %23 = math.exp %22 : vector<8x8xf32>
    %24 = math.log1p %23 : vector<8x8xf32>
    %25 = arith.select %20, %18, %24 : vector<8x8xi1>, vector<8x8xf32>
    %26 = arith.mulf %25, %5 : vector<8x8xf32>
    %27 = vector.shape_cast %25 : vector<8x8xf32> to vector<8x1x8xf32>
    %28 = vector.shape_cast %9 : vector<16x8xf32> to vector<1x16x8xf32>
    %29 = vector.broadcast %27 : vector<8x1x8xf32> to vector<8x16x8xf32>
    %30 = vector.broadcast %28 : vector<1x16x8xf32> to vector<8x16x8xf32>
    %31 = arith.mulf %29, %30 : vector<8x16x8xf32>
    %32 = math.exp %31 : vector<8x16x8xf32>
    %c0_16 = arith.constant 0 : index
    %c0_17 = arith.constant 0 : index
    %c0_18 = arith.constant 0 : index
    %33 = vector.load %arg9[%c0_16, %c0_17, %c0_18] : memref<8x16x8xf32, #tpu.memory_space<vmem>>, vector<8x16x8xf32>
    tpu.vector_store %arg9[%c0_16, %c0_17, %c0_18], %32 {strides = array<i32>} : memref<8x16x8xf32, #tpu.memory_space<vmem>>, vector<8x16x8xf32>,
    %34 = vector.shape_cast %26 : vector<8x8xf32> to vector<8x1x8xf32>
    %35 = vector.shape_cast %13 : vector<8x16xf32> to vector<8x16x1xf32>
    %36 = vector.broadcast %34 : vector<8x1x8xf32> to vector<8x16x8xf32>
    %37 = vector.broadcast %35 : vector<8x16x1xf32> to vector<8x16x8xf32>
    %38 = arith.mulf %36, %37 : vector<8x16x8xf32>
    %c0_19 = arith.constant 0 : index
    %c0_20 = arith.constant 0 : index
    %c0_21 = arith.constant 0 : index
    %39 = vector.load %arg10[%c0_19, %c0_20, %c0_21] : memref<8x16x8xf32, #tpu.memory_space<vmem>>, vector<8x16x8xf32>
    tpu.vector_store %arg10[%c0_19, %c0_20, %c0_21], %38 {strides = array<i32>} : memref<8x16x8xf32, #tpu.memory_space<vmem>>, vector<8x16x8xf32>,
    %c0_22 = arith.constant 0 : index
    %c0_23 = arith.constant 0 : index
    %40 = vector.load %arg11[%c0_22, %c0_23] : memref<16x8xf32, #tpu.memory_space<vmem>>, vector<16x8xf32>
    %c0_i32_24 = arith.constant 0 : i32
    %41 = arith.index_cast %c0_i32_24 : i32 to index
    %c0_25 = arith.constant 0 : index
    %c0_26 = arith.constant 0 : index
    %42 = vector.load %arg9[%41, %c0_25, %c0_26] : memref<8x16x8xf32, #tpu.memory_space<vmem>>, vector<1x16x8xf32>
    %43 = vector.shape_cast %42 : vector<1x16x8xf32> to vector<16x8xf32>
    %44 = arith.mulf %43, %40 : vector<16x8xf32>
    %45 = arith.index_cast %c0_i32_24 : i32 to index
    %c0_27 = arith.constant 0 : index
    %c0_28 = arith.constant 0 : index
    %46 = vector.load %arg10[%45, %c0_27, %c0_28] : memref<8x16x8xf32, #tpu.memory_space<vmem>>, vector<1x16x8xf32>
    %47 = vector.shape_cast %46 : vector<1x16x8xf32> to vector<16x8xf32>
    %48 = arith.addf %44, %47 : vector<16x8xf32>
    %49 = arith.index_cast %c0_i32_24 : i32 to index
    %c0_29 = arith.constant 0 : index
    %c0_30 = arith.constant 0 : index
    %50 = vector.load %arg10[%49, %c0_29, %c0_30] : memref<8x16x8xf32, #tpu.memory_space<vmem>>, vector<1x16x8xf32>
    %51 = vector.shape_cast %50 : vector<1x16x8xf32> to vector<16x8xf32>
    %52 = vector.shape_cast %48 : vector<16x8xf32> to vector<1x16x8xf32>
    tpu.vector_store %arg10[%49, %c0_29, %c0_30], %52 {strides = array<i32>} : memref<8x16x8xf32, #tpu.memory_space<vmem>>, vector<1x16x8xf32>,
    %c1_i32 = arith.constant 1 : i32
    %53 = arith.index_cast %c1_i32 : i32 to index
    %c0_31 = arith.constant 0 : index
    %c0_32 = arith.constant 0 : index
    %54 = vector.load %arg9[%53, %c0_31, %c0_32] : memref<8x16x8xf32, #tpu.memory_space<vmem>>, vector<1x16x8xf32>
    %55 = vector.shape_cast %54 : vector<1x16x8xf32> to vector<16x8xf32>
    %56 = arith.mulf %55, %48 : vector<16x8xf32>
    %57 = arith.index_cast %c1_i32 : i32 to index
    %c0_33 = arith.constant 0 : index
    %c0_34 = arith.constant 0 : index
    %58 = vector.load %arg10[%57, %c0_33, %c0_34] : memref<8x16x8xf32, #tpu.memory_space<vmem>>, vector<1x16x8xf32>
    %59 = vector.shape_cast %58 : vector<1x16x8xf32> to vector<16x8xf32>
    %60 = arith.addf %56, %59 : vector<16x8xf32>
    %61 = arith.index_cast %c1_i32 : i32 to index
    %c0_35 = arith.constant 0 : index
    %c0_36 = arith.constant 0 : index
    %62 = vector.load %arg10[%61, %c0_35, %c0_36] : memref<8x16x8xf32, #tpu.memory_space<vmem>>, vector<1x16x8xf32>
    %63 = vector.shape_cast %62 : vector<1x16x8xf32> to vector<16x8xf32>
    %64 = vector.shape_cast %60 : vector<16x8xf32> to vector<1x16x8xf32>
    tpu.vector_store %arg10[%61, %c0_35, %c0_36], %64 {strides = array<i32>} : memref<8x16x8xf32, #tpu.memory_space<vmem>>, vector<1x16x8xf32>,
    %c2_i32 = arith.constant 2 : i32
    %65 = arith.index_cast %c2_i32 : i32 to index
    %c0_37 = arith.constant 0 : index
    %c0_38 = arith.constant 0 : index
    %66 = vector.load %arg9[%65, %c0_37, %c0_38] : memref<8x16x8xf32, #tpu.memory_space<vmem>>, vector<1x16x8xf32>
    %67 = vector.shape_cast %66 : vector<1x16x8xf32> to vector<16x8xf32>
    %68 = arith.mulf %67, %60 : vector<16x8xf32>
    %69 = arith.index_cast %c2_i32 : i32 to index
    %c0_39 = arith.constant 0 : index
    %c0_40 = arith.constant 0 : index
    %70 = vector.load %arg10[%69, %c0_39, %c0_40] : memref<8x16x8xf32, #tpu.memory_space<vmem>>, vector<1x16x8xf32>
    %71 = vector.shape_cast %70 : vector<1x16x8xf32> to vector<16x8xf32>
    %72 = arith.addf %68, %71 : vector<16x8xf32>
    %73 = arith.index_cast %c2_i32 : i32 to index
    %c0_41 = arith.constant 0 : index
    %c0_42 = arith.constant 0 : index
    %74 = vector.load %arg10[%73, %c0_41, %c0_42] : memref<8x16x8xf32, #tpu.memory_space<vmem>>, vector<1x16x8xf32>
    %75 = vector.shape_cast %74 : vector<1x16x8xf32> to vector<16x8xf32>
    %76 = vector.shape_cast %72 : vector<16x8xf32> to vector<1x16x8xf32>
    tpu.vector_store %arg10[%73, %c0_41, %c0_42], %76 {strides = array<i32>} : memref<8x16x8xf32, #tpu.memory_space<vmem>>, vector<1x16x8xf32>,
    %c3_i32 = arith.constant 3 : i32
    %77 = arith.index_cast %c3_i32 : i32 to index
    %c0_43 = arith.constant 0 : index
    %c0_44 = arith.constant 0 : index
    %78 = vector.load %arg9[%77, %c0_43, %c0_44] : memref<8x16x8xf32, #tpu.memory_space<vmem>>, vector<1x16x8xf32>
    %79 = vector.shape_cast %78 : vector<1x16x8xf32> to vector<16x8xf32>
    %80 = arith.mulf %79, %72 : vector<16x8xf32>
    %81 = arith.index_cast %c3_i32 : i32 to index
    %c0_45 = arith.constant 0 : index
    %c0_46 = arith.constant 0 : index
    %82 = vector.load %arg10[%81, %c0_45, %c0_46] : memref<8x16x8xf32, #tpu.memory_space<vmem>>, vector<1x16x8xf32>
    %83 = vector.shape_cast %82 : vector<1x16x8xf32> to vector<16x8xf32>
    %84 = arith.addf %80, %83 : vector<16x8xf32>
    %85 = arith.index_cast %c3_i32 : i32 to index
    %c0_47 = arith.constant 0 : index
    %c0_48 = arith.constant 0 : index
    %86 = vector.load %arg10[%85, %c0_47, %c0_48] : memref<8x16x8xf32, #tpu.memory_space<vmem>>, vector<1x16x8xf32>
    %87 = vector.shape_cast %86 : vector<1x16x8xf32> to vector<16x8xf32>
    %88 = vector.shape_cast %84 : vector<16x8xf32> to vector<1x16x8xf32>
    tpu.vector_store %arg10[%85, %c0_47, %c0_48], %88 {strides = array<i32>} : memref<8x16x8xf32, #tpu.memory_space<vmem>>, vector<1x16x8xf32>,
    %c4_i32 = arith.constant 4 : i32
    %89 = arith.index_cast %c4_i32 : i32 to index
    %c0_49 = arith.constant 0 : index
    %c0_50 = arith.constant 0 : index
    %90 = vector.load %arg9[%89, %c0_49, %c0_50] : memref<8x16x8xf32, #tpu.memory_space<vmem>>, vector<1x16x8xf32>
    %91 = vector.shape_cast %90 : vector<1x16x8xf32> to vector<16x8xf32>
    %92 = arith.mulf %91, %84 : vector<16x8xf32>
    %93 = arith.index_cast %c4_i32 : i32 to index
    %c0_51 = arith.constant 0 : index
    %c0_52 = arith.constant 0 : index
    %94 = vector.load %arg10[%93, %c0_51, %c0_52] : memref<8x16x8xf32, #tpu.memory_space<vmem>>, vector<1x16x8xf32>
    %95 = vector.shape_cast %94 : vector<1x16x8xf32> to vector<16x8xf32>
    %96 = arith.addf %92, %95 : vector<16x8xf32>
    %97 = arith.index_cast %c4_i32 : i32 to index
    %c0_53 = arith.constant 0 : index
    %c0_54 = arith.constant 0 : index
    %98 = vector.load %arg10[%97, %c0_53, %c0_54] : memref<8x16x8xf32, #tpu.memory_space<vmem>>, vector<1x16x8xf32>
    %99 = vector.shape_cast %98 : vector<1x16x8xf32> to vector<16x8xf32>
    %100 = vector.shape_cast %96 : vector<16x8xf32> to vector<1x16x8xf32>
    tpu.vector_store %arg10[%97, %c0_53, %c0_54], %100 {strides = array<i32>} : memref<8x16x8xf32, #tpu.memory_space<vmem>>, vector<1x16x8xf32>,
    %c5_i32 = arith.constant 5 : i32
    %101 = arith.index_cast %c5_i32 : i32 to index
    %c0_55 = arith.constant 0 : index
    %c0_56 = arith.constant 0 : index
    %102 = vector.load %arg9[%101, %c0_55, %c0_56] : memref<8x16x8xf32, #tpu.memory_space<vmem>>, vector<1x16x8xf32>
    %103 = vector.shape_cast %102 : vector<1x16x8xf32> to vector<16x8xf32>
    %104 = arith.mulf %103, %96 : vector<16x8xf32>
    %105 = arith.index_cast %c5_i32 : i32 to index
    %c0_57 = arith.constant 0 : index
    %c0_58 = arith.constant 0 : index
    %106 = vector.load %arg10[%105, %c0_57, %c0_58] : memref<8x16x8xf32, #tpu.memory_space<vmem>>, vector<1x16x8xf32>
    %107 = vector.shape_cast %106 : vector<1x16x8xf32> to vector<16x8xf32>
    %108 = arith.addf %104, %107 : vector<16x8xf32>
    %109 = arith.index_cast %c5_i32 : i32 to index
    %c0_59 = arith.constant 0 : index
    %c0_60 = arith.constant 0 : index
    %110 = vector.load %arg10[%109, %c0_59, %c0_60] : memref<8x16x8xf32, #tpu.memory_space<vmem>>, vector<1x16x8xf32>
    %111 = vector.shape_cast %110 : vector<1x16x8xf32> to vector<16x8xf32>
    %112 = vector.shape_cast %108 : vector<16x8xf32> to vector<1x16x8xf32>
    tpu.vector_store %arg10[%109, %c0_59, %c0_60], %112 {strides = array<i32>} : memref<8x16x8xf32, #tpu.memory_space<vmem>>, vector<1x16x8xf32>,
    %c6_i32 = arith.constant 6 : i32
    %113 = arith.index_cast %c6_i32 : i32 to index
    %c0_61 = arith.constant 0 : index
    %c0_62 = arith.constant 0 : index
    %114 = vector.load %arg9[%113, %c0_61, %c0_62] : memref<8x16x8xf32, #tpu.memory_space<vmem>>, vector<1x16x8xf32>
    %115 = vector.shape_cast %114 : vector<1x16x8xf32> to vector<16x8xf32>
    %116 = arith.mulf %115, %108 : vector<16x8xf32>
    %117 = arith.index_cast %c6_i32 : i32 to index
    %c0_63 = arith.constant 0 : index
    %c0_64 = arith.constant 0 : index
    %118 = vector.load %arg10[%117, %c0_63, %c0_64] : memref<8x16x8xf32, #tpu.memory_space<vmem>>, vector<1x16x8xf32>
    %119 = vector.shape_cast %118 : vector<1x16x8xf32> to vector<16x8xf32>
    %120 = arith.addf %116, %119 : vector<16x8xf32>
    %121 = arith.index_cast %c6_i32 : i32 to index
    %c0_65 = arith.constant 0 : index
    %c0_66 = arith.constant 0 : index
    %122 = vector.load %arg10[%121, %c0_65, %c0_66] : memref<8x16x8xf32, #tpu.memory_space<vmem>>, vector<1x16x8xf32>
    %123 = vector.shape_cast %122 : vector<1x16x8xf32> to vector<16x8xf32>
    %124 = vector.shape_cast %120 : vector<16x8xf32> to vector<1x16x8xf32>
    tpu.vector_store %arg10[%121, %c0_65, %c0_66], %124 {strides = array<i32>} : memref<8x16x8xf32, #tpu.memory_space<vmem>>, vector<1x16x8xf32>,
    %c7_i32 = arith.constant 7 : i32
    %125 = arith.index_cast %c7_i32 : i32 to index
    %c0_67 = arith.constant 0 : index
    %c0_68 = arith.constant 0 : index
    %126 = vector.load %arg9[%125, %c0_67, %c0_68] : memref<8x16x8xf32, #tpu.memory_space<vmem>>, vector<1x16x8xf32>
    %127 = vector.shape_cast %126 : vector<1x16x8xf32> to vector<16x8xf32>
    %128 = arith.mulf %127, %120 : vector<16x8xf32>
    %129 = arith.index_cast %c7_i32 : i32 to index
    %c0_69 = arith.constant 0 : index
    %c0_70 = arith.constant 0 : index
    %130 = vector.load %arg10[%129, %c0_69, %c0_70] : memref<8x16x8xf32, #tpu.memory_space<vmem>>, vector<1x16x8xf32>
    %131 = vector.shape_cast %130 : vector<1x16x8xf32> to vector<16x8xf32>
    %132 = arith.addf %128, %131 : vector<16x8xf32>
    %133 = arith.index_cast %c7_i32 : i32 to index
    %c0_71 = arith.constant 0 : index
    %c0_72 = arith.constant 0 : index
    %134 = vector.load %arg10[%133, %c0_71, %c0_72] : memref<8x16x8xf32, #tpu.memory_space<vmem>>, vector<1x16x8xf32>
    %135 = vector.shape_cast %134 : vector<1x16x8xf32> to vector<16x8xf32>
    %136 = vector.shape_cast %132 : vector<16x8xf32> to vector<1x16x8xf32>
    tpu.vector_store %arg10[%133, %c0_71, %c0_72], %136 {strides = array<i32>} : memref<8x16x8xf32, #tpu.memory_space<vmem>>, vector<1x16x8xf32>,
    %c8_i32 = arith.constant 8 : i32
    %c0_73 = arith.constant 0 : index
    %c0_74 = arith.constant 0 : index
    %137 = vector.load %arg11[%c0_73, %c0_74] : memref<16x8xf32, #tpu.memory_space<vmem>>, vector<16x8xf32>
    tpu.vector_store %arg11[%c0_73, %c0_74], %132 {strides = array<i32>} : memref<16x8xf32, #tpu.memory_space<vmem>>, vector<16x8xf32>,
    %c0_75 = arith.constant 0 : index
    %c0_76 = arith.constant 0 : index
    %c0_77 = arith.constant 0 : index
    %138 = vector.load %arg10[%c0_75, %c0_76, %c0_77] : memref<8x16x8xf32, #tpu.memory_space<vmem>>, vector<8x16x8xf32>
    %139 = vector.shape_cast %14 : vector<8x16xf32> to vector<8x16x1xf32>
    %140 = vector.broadcast %139 : vector<8x16x1xf32> to vector<8x16x8xf32>
    %141 = arith.mulf %138, %140 : vector<8x16x8xf32>
    %cst_78 = arith.constant dense<0.000000e+00> : vector<8x8xf32>
    %142 = vector.multi_reduction <add>, %141, %cst_78 [1] : vector<8x16x8xf32> to vector<8x8xf32>
    %143 = vector.broadcast %10 : vector<1x8xf32> to vector<8x8xf32>
    %144 = arith.mulf %5, %143 : vector<8x8xf32>
    %145 = arith.addf %142, %144 : vector<8x8xf32>
    %c0_79 = arith.constant 0 : index
    %c0_80 = arith.constant 0 : index
    %c0_81 = arith.constant 0 : index
    %146 = vector.load %arg8[%c0_79, %c0_80, %c0_81] : memref<1x8x8xf32, #tpu.memory_space<vmem>>, vector<1x8x8xf32>
    %147 = vector.shape_cast %146 : vector<1x8x8xf32> to vector<8x8xf32>
    %148 = vector.shape_cast %145 : vector<8x8xf32> to vector<1x8x8xf32>
    tpu.vector_store %arg8[%c0_79, %c0_80, %c0_81], %148 {strides = array<i32>} : memref<1x8x8xf32, #tpu.memory_space<vmem>>, vector<1x8x8xf32>,
    return
  }
  func.func @transform_0(%arg0: i32, %arg1: i32) -> (i32, i32, i32) {
    %c0_i32 = arith.constant 0 : i32
    %c0_i32_0 = arith.constant 0 : i32
    return %arg0, %arg1, %c0_i32 : i32, i32, i32
  }
  func.func @transform_1(%arg0: i32, %arg1: i32) -> (i32, i32) {
    %c0_i32 = arith.constant 0 : i32
    %c0_i32_0 = arith.constant 0 : i32
    %c0_i32_1 = arith.constant 0 : i32
    return %c0_i32, %c0_i32_0 : i32, i32
  }
  func.func @transform_2(%arg0: i32, %arg1: i32) -> (i32, i32) {
    %c0_i32 = arith.constant 0 : i32
    %c0_i32_0 = arith.constant 0 : i32
    %c0_i32_1 = arith.constant 0 : i32
    return %c0_i32, %c0_i32_0 : i32, i32
  }
  func.func @transform_3(%arg0: i32, %arg1: i32) -> (i32, i32) {
    %c0_i32 = arith.constant 0 : i32
    %c0_i32_0 = arith.constant 0 : i32
    %c0_i32_1 = arith.constant 0 : i32
    return %c0_i32, %c0_i32_0 : i32, i32
  }
  func.func @transform_4(%arg0: i32, %arg1: i32) -> (i32, i32) {
    %c0_i32 = arith.constant 0 : i32
    %c0_i32_0 = arith.constant 0 : i32
    %c0_i32_1 = arith.constant 0 : i32
    return %c0_i32, %c0_i32_0 : i32, i32
  }
  func.func @transform_5(%arg0: i32, %arg1: i32) -> (i32, i32) {
    %c0_i32 = arith.constant 0 : i32
    %c0_i32_0 = arith.constant 0 : i32
    %c0_i32_1 = arith.constant 0 : i32
    return %c0_i32, %c0_i32_0 : i32, i32
  }
  func.func @transform_6(%arg0: i32, %arg1: i32) -> (i32, i32, i32) {
    %c0_i32 = arith.constant 0 : i32
    %c0_i32_0 = arith.constant 0 : i32
    return %arg0, %arg1, %c0_i32 : i32, i32, i32
  }
}

</mosaic_0001>

<bundles_post_ra>
// kernel: tpu_custom_call.1
= control target key start
LH: loop header
LB: loop body
LE: loop exit
PB: predicated region body
PF: predicated region fallthrough
CT: control target
= control target key end

     0   :  { %s1394_s21 = smov 0   ;;  %s1396_s22 = smov 0   ;;  %s1639_s0 = inlined_call_operand.vmem [shape: bf16[2,16,8], index: 0, kind: input, shape index: {}]   ;;  %s1640_s1 = inlined_call_operand.vmem [shape: bf16[8,36], index: 1, kind: input, shape index: {}]   ;;  %s1641_s2 = inlined_call_operand.vmem [shape: bf16[4,8], index: 2, kind: input, shape index: {}]   ;;  %s1642_s3 = inlined_call_operand.vmem [shape: f32[1,8], index: 3, kind: input, shape index: {}]   ;;  %s1643_s4 = inlined_call_operand.vmem [shape: f32[16,8], index: 4, kind: input, shape index: {}]   ;;  %s1644_s5 = inlined_call_operand.vmem [shape: f32[1,8], index: 5, kind: input, shape index: {}]   ;;  %s1645_s6 = inlined_call_operand.vmem [shape: f32[2,16,8], index: 6, kind: output, shape index: {}]  }
   0x1   :  { %s1398_s23 = smov 0   ;;  %s1400_s24 = smov 0  }
   0x2   :  { %s1402_s25 = smov 0  }
   0x3 LB: > { %s25_s26 = sadd.s32 1, %s1345_s23  ;;  %s28_s27 = sadd.s32 1, %s1349_s24  ;;  %s1353_s25 = sphi %s1402_s25, %s16_s25   ;;  %s1349_s24 = sphi %s1400_s24, %s1649_s24   ;;  %s1345_s23 = sphi %s1398_s23, %s1648_s23   ;;  %s1341_s22 = sphi %s1396_s22, %s1647_s22   ;;  %s1337_s21 = sphi %s1394_s21, %s1646_s21  }
   0x4   : > { %p26_p0 = scmp.ge.s32.totalorder %s25_s26, 2  ;;  %p1207_p1 = scmp.ge.s32.totalorder %s1353_s25, 1 }
   0x5   : > { %p231_p2 = scmp.lt.s32.totalorder %s1353_s25, 5 }
   0x6   : > { %s1651_s26 = smov (%p26_p0, %s25_s26), 0  ;;  %s1653_s27 = smov (!%p26_p0, %s28_s27), %s1349_s24 }
   0x7   : > { %p232_p3 = pnand %p1207_p1, %p231_p2  ;;  %p30_p4 = scmp.ge.s32.totalorder %s1653_s27, 2 }
   0x8   : > { %p267_p5 = scmp.lt.s32.totalorder (!%p232_p3), %s1341_s22, 1  ;;  %p269_p6 = scmp.lt.s32.totalorder (!%p232_p3), %s1337_s21, 1 }
   0x9   : > { %s1655_s27 = smov (%p30_p4, %s1653_s27), 0  ;;  %235 = sbr.rel (%p232_p3) target bundleno = 586 (0x24a), region = 44 }
   0xa   : > { %p1212_p7 = scmp.ne.s32.totalorder (!%p232_p3), %s1337_s21, 0 }
  0x10   : > { %s1657_s22 = smov (!%p267_p5, %s1341_s22), 1  ;;  %287 = sbr.rel (%p1212_p7) target bundleno = 23 (0x17), region = 48 }
  0x11   : > { %s270_s28 = scalar_select %p269_p6, %s1337_s21, 1 }
  0x12   : > { %s1208_s29 = sshll.u32 %s1657_s22, 1  ;;  %vm288_vm0 = vcmask (!%p1212_p7), 64512   ;;  %v1355_v0 = vmov (!%p1212_p7), 0.0  }
  0x13   : > { %s272_s30 = sadd.s32 %s1208_s29, %s270_s28  ;;  %289 = vst.msk [vmem:[#allocation4] sm:$0xff] (!%p1212_p7), %vm288_vm0, %v1355_v0  ;;  %290 = vst.msk [vmem:[#allocation4 + $0x8] sm:$0xff] (!%p1212_p7), %vm288_vm0, %v1355_v0 }
  0x14   : > { %s1209_s7 = sshll.u32 %s272_s30, 2  ;;  %s1211_s8 = sshll.u32 %s272_s30, 3 }
  0x15   : > { %s274_s11 = scalar_lea.vmem %s1639_s0, %s1209_s7  ;;  %s1430_s14 = scalar_lea.vmem %s1645_s6, %s1211_s8 }
  0x17 PF: > { %v293_v1 = vld [vmem:[%s1640_s1] sm:$0xf]  ;;  %vm303_vm1 = vcmask 1043456   ;;  %v1356_v2 = vmov 0.0   ;;  %vm1357_vm2 = vmmov 0   ;;  %vm299_vm3 = vcmask 64512  }
  0x18   : > { %1223 = vmatprep.subr.bf16.mxu0 %v1356_v2  ;;  %v305_v3 = vsel %vm303_vm1, %v293_v1, 0  ;;  %1225 = vmatprep.mubr.msk.bf16.mxu0 %vm1357_vm2, %v1356_v2  ;;  %v1435_v4 = vld [vmem:[%s274_s11] sm:$0xf]  ;;  %vm358_vm4 = vcmask 1041408   ;;  %v422_v7 = vlaneseq  ;;  %vm354_vm5 = vcmask 31744  }
  0x19   : > { %1224 = vmatpush3.bf16.msra.mxu0 %v305_v3  ;;  %1229 = vmatprep.subr.bf16.mxu1 %v1356_v2  ;;  %v294_v5 = vld [vmem:[%s1641_s2] sm:$0x3]  ;;  %v1358_v44 = vmov 1966171168   ;;  %v292_v53 = vunpack.c.l.bf16 %v1435_v4  ;;  %vm1095_vm8 = vcmask 1041409   ;;  %vm1098_vm9 = vcmask 1042434  }
  0x1a   : > { %1231 = vmatprep.mubr.msk.bf16.mxu1 %vm1357_vm2, %v1356_v2  ;;  %v360_v6 = vsel %vm358_vm4, %v294_v5, 0  ;;  %v1442_v8 = vshrl.u32 %v422_v7, 7  ;;  %v1214_v30 = vld [vmem:[%s1642_s3] ss:$0 sm:$0xff]  ;;  %v420_v45 = vunpack.c.l.s4 %v1358_v44  ;;  %vm1101_vm10 = vcmask 1043459  }
  0x1b   : > { %1230 = vmatpush3.bf16.msra.mxu1 %v360_v6  ;;  %v296_v6 = vld [vmem:[%s1643_s4] sm:$0xff]  ;;  %vm1104_vm11 = vcmask 1044484   ;;  %vm1107_vm12 = vcmask 1045509   ;;  %vm1110_vm13 = vcmask 1046534   ;;  %vm1113_vm14 = vcmask 1047559  }
  0x1c   : > { %1226 = vmatmul.mubr.msk.bf16.vlgmr.msra.gmra.mrb[0].mxu0 %vm299_vm3, %v1435_v4  ;;  %v1445_v9 = vsub.s32 0, %v1442_v8  ;;  %v635_v10 = vsub.s32 1, %v1442_v8  ;;  %v647_v18 = vsub.s32 2, %v1442_v8  ;;  %v659_v20 = vsub.s32 3, %v1442_v8 }
  0x1d   : > { %v671_v22 = vsub.s32 4, %v1442_v8  ;;  %v683_v24 = vsub.s32 5, %v1442_v8  ;;  %v695_v26 = vsub.s32 6, %v1442_v8  ;;  %v707_v28 = vsub.s32 7, %v1442_v8 }
  0x1e   : > { %v421_v48 = vunpack.c.0.s8 %v420_v45 }
  0x20   : > { %v1472_v56 = vsub.s32 %v421_v48, %v1442_v8 }
  0xef   : > { %v341_v11 = vpop.f32.mrb[0].mxu0 }
  0xf0   : > { %v1227_v12 = vpop.f32.mrb[1].mxu0  ;;  %v636_v13 = vrot.slane %v341_v11, %v635_v10  ;;  %v624_v14 = vrot.slane %v341_v11, %v1445_v9  ;;  %v347_v15 = vpack.c.bf16 %v341_v11, %v341_v11  ;;  %v648_v19 = vrot.slane %v341_v11, %v647_v18 }
  0xf1   : > { %v344_v16 = vpop.f32.mrb[2].mxu0  ;;  %v660_v21 = vrot.slane %v341_v11, %v659_v20  ;;  %v672_v23 = vrot.slane %v341_v11, %v671_v22  ;;  %v684_v25 = vrot.slane %v341_v11, %v683_v24  ;;  %v696_v27 = vrot.slane %v341_v11, %v695_v26 }
  0xf2   : > { %639 = vbcast.lane.b32.xlu1 %v636_v13, 260  ;;  %627 = vbcast.lane.b32.xlu0 %v624_v14, 260  ;;  %v1228_v17 = vpop.f32.mrb[3].mxu0  ;;  %v708_v29 = vrot.slane %v341_v11, %v707_v28  ;;  %v297_v16 = vld [vmem:[%s1643_s4 + $0x8] sm:$0xff] }
  0xf3   : > { %1232 = vmatmul.mubr.msk.bf16.vlgmr.msra.gmra.mrb[0].mxu1 %vm354_vm5, %v347_v15 }
  0xf6   : > { %643 = vbcast.lane.b32.xlu1 %v636_v13, 268  ;;  %631 = vbcast.lane.b32.xlu0 %v624_v14, 268 }
  0xfa   : > { %655 = vbcast.lane.b32.xlu1 %v648_v19, 268  ;;  %651 = vbcast.lane.b32.xlu0 %v648_v19, 260 }
  0xfe   : > { %667 = vbcast.lane.b32.xlu1 %v660_v21, 268  ;;  %663 = vbcast.lane.b32.xlu0 %v660_v21, 260 }
 0x102   : > { %679 = vbcast.lane.b32.xlu1 %v672_v23, 268  ;;  %675 = vbcast.lane.b32.xlu0 %v672_v23, 260 }
 0x106   : > { %691 = vbcast.lane.b32.xlu1 %v684_v25, 268  ;;  %687 = vbcast.lane.b32.xlu0 %v684_v25, 260 }
 0x10a   : > { %703 = vbcast.lane.b32.xlu1 %v696_v27, 268  ;;  %699 = vbcast.lane.b32.xlu0 %v696_v27, 260 }
 0x10e   : > { %715 = vbcast.lane.b32.xlu1 %v708_v29, 268  ;;  %711 = vbcast.lane.b32.xlu0 %v708_v29, 260 }
 0x112   : > { %917 = vbcast.lane.b32.xlu1 %v636_v13, 284  ;;  %913 = vbcast.lane.b32.xlu0 %v636_v13, 276 }
 0x116   : > { %925 = vbcast.lane.b32.xlu1 %v648_v19, 284  ;;  %921 = vbcast.lane.b32.xlu0 %v648_v19, 276 }
 0x11a   : > { %909 = vbcast.lane.b32.xlu1 %v624_v14, 284  ;;  %905 = vbcast.lane.b32.xlu0 %v624_v14, 276 }
 0x11e   : > { %933 = vbcast.lane.b32.xlu1 %v660_v21, 284  ;;  %929 = vbcast.lane.b32.xlu0 %v660_v21, 276 }
 0x122   : > { %941 = vbcast.lane.b32.xlu1 %v672_v23, 284  ;;  %937 = vbcast.lane.b32.xlu0 %v672_v23, 276 }
 0x126   : > { %949 = vbcast.lane.b32.xlu1 %v684_v25, 284  ;;  %945 = vbcast.lane.b32.xlu0 %v684_v25, 276 }
 0x12a   : > { %957 = vbcast.lane.b32.xlu1 %v696_v27, 284  ;;  %953 = vbcast.lane.b32.xlu0 %v696_v27, 276 }
 0x12e   : > { %965 = vbcast.lane.b32.xlu1 %v708_v29, 284  ;;  %961 = vbcast.lane.b32.xlu0 %v708_v29, 276 }
 0x164   : > { %v1458_v39 = vpop.permute.xlu0 %627  ;;  %v1460_v40 = vpop.permute.xlu1 %639 }
 0x168   : > { %v1462_v42 = vpop.permute.xlu0 %631  ;;  %v1464_v46 = vpop.permute.xlu1 %643 }
 0x16c   : > { %v1466_v50 = vpop.permute.xlu0 %651  ;;  %v1468_v52 = vpop.permute.xlu1 %655 }
 0x170   : > { %v1474_v59 = vpop.permute.xlu0 %663  ;;  %v1479_v63 = vpop.permute.xlu1 %667 }
 0x174   : > { %v1495_v15 = vpop.permute.xlu0 %675  ;;  %v1502_v21 = vpop.permute.xlu1 %679 }
 0x178   : > { %v1512_v45 = vpop.permute.xlu0 %687 }
 0x1c6   : > { %v396_v31 = vpop.f32.mrb[0].mxu1 }
 0x1c7   : > { %v397_v32 = vadd.f32 %v1214_v30, %v396_v31  ;;  %v1233_v33 = vpop.f32.mrb[1].mxu1 }
 0x1c8   : > { %v399_v34 = vpop.f32.mrb[2].mxu1 }
 0x1c9   : > { %v403_v35 = vmin.f32 %v397_v32, 20.0  ;;  %v1234_v36 = vpop.f32.mrb[3].mxu1  ;;  %vm402_vm7 = vcmp.gt.f32.partialorder %v397_v32, 20.0 }
 0x1cb   : > { %v404_v37 = vmul.f32 1.442695, %v403_v35 }
 0x1cd   : > { %1279 = vpow2.f32 %v404_v37 }
 0x1d7   : > { %v1280_v38 = vpop.eup %1279 }
 0x1d8   : > { %v406_v41 = vadd.f32 1.0, %v1280_v38  ;;  %v409_v43 = vmul.f32 -0.5, %v1280_v38  ;;  %v412_v49 = vand.u32 2147483647, %v1280_v38 }
 0x1da   : > { %1281 = vlog2.f32 %v406_v41  ;;  %v410_v47 = vadd.f32 1.0, %v409_v43  ;;  %vm413_vm6 = vcmp.lt.f32.partialorder %v412_v49, 0.0004427343 }
 0x1dc   : > { %v411_v55 = vmul.f32 %v1280_v38, %v410_v47 }
 0x1e4   : > { %v1282_v51 = vpop.eup %1281 }
 0x1e5   : > { %v408_v54 = vmul.f32 0.6931472, %v1282_v51 }
 0x1e7   : > { %v414_v57 = vsel %vm413_vm6, %v411_v55, %v408_v54  ;;  %v1514_v54 = vpop.permute.xlu1 %691 }
 0x1e8   : > { %v415_v58 = vsel %vm402_vm7, %v397_v32, %v414_v57 }
 0x1e9   : > { %v416_v60 = vmul.f32 %v415_v58, %v292_v53  ;;  %v418_v61 = vcombine.high %v415_v58, %v415_v58  ;;  %v425_v62 = vrot.slane %v415_v58, %v1472_v56 }
 0x1eb   : > { %v432_v0 = vrot.slane %v418_v61, %v1472_v56  ;;  %v433_v1 = vcombine.high %v425_v62, %v425_v62  ;;  %v441_v2 = vrot.slane %v425_v62, %v1472_v56  ;;  %v572_v3 = vcombine.high %v416_v60, %v416_v60 }
 0x1ec   : > { %v1484_v5 = vrot.slane %v416_v60, %v1472_v56 }
 0x1ed   : > { %v434_v7 = vcombine.high %v432_v0, %v432_v0  ;;  %v448_v8 = vrot.slane %v432_v0, %v1472_v56  ;;  %v455_v10 = vrot.slane %v433_v1, %v1472_v56  ;;  %v463_v11 = vcombine.high %v441_v2, %v441_v2 }
 0x1ee   : > { %v470_v12 = vrot.slane %v441_v2, %v1445_v9  ;;  %v586_v13 = vrot.slane %v572_v3, %v1472_v56  ;;  %v587_v14 = vcombine.high %v1484_v5, %v1484_v5  ;;  %v595_v25 = vrot.slane %v1484_v5, %v1472_v56 }
 0x1ef   : > { %v462_v17 = vrot.slane %v434_v7, %v1472_v56  ;;  %v464_v18 = vcombine.high %v448_v8, %v448_v8  ;;  %v465_v19 = vcombine.high %v455_v10, %v455_v10  ;;  %v474_v20 = vrot.slane %v455_v10, %v1445_v9 }
 0x1f0   : > { %v478_v22 = vrot.slane %v463_v11, %v1445_v9  ;;  %v486_v23 = vrot.slane %v448_v8, %v1445_v9  ;;  %v507_v24 = vmul.f32 %v470_v12, %v296_v6  ;;  %v508_v30 = vmul.f32 %v470_v12, %v297_v16  ;;  %v700_v12 = vpop.permute.xlu0 %699 }
 0x1f1   : > { %v466_v26 = vcombine.high %v462_v17, %v462_v17  ;;  %v482_v27 = vrot.slane %v465_v19, %v1445_v9  ;;  %v490_v28 = vrot.slane %v462_v17, %v1445_v9  ;;  %v494_v29 = vrot.slane %v464_v18, %v1445_v9  ;;  %v704_v19 = vpop.permute.xlu1 %703 }
 0x1f2   : > { %v509_v31 = vmul.f32 %v474_v20, %v296_v6  ;;  %v510_v32 = vmul.f32 %v474_v20, %v297_v16  ;;  %v511_v33 = vmul.f32 %v478_v22, %v296_v6  ;;  %v512_v35 = vmul.f32 %v478_v22, %v297_v16 }
 0x1f3   : > { %v498_v34 = vrot.slane %v466_v26, %v1445_v9  ;;  %v513_v36 = vmul.f32 %v482_v27, %v296_v6  ;;  %v514_v37 = vmul.f32 %v482_v27, %v297_v16  ;;  %v515_v38 = vmul.f32 %v486_v23, %v296_v6 }
 0x1f4   : > { %v516_v41 = vmul.f32 %v486_v23, %v297_v16  ;;  %v517_v43 = vmul.f32 %v490_v28, %v296_v6  ;;  %v518_v44 = vmul.f32 %v490_v28, %v297_v16  ;;  %v519_v47 = vmul.f32 %v494_v29, %v296_v6 }
 0x1f5   : > { %v520_v48 = vmul.f32 %v494_v29, %v297_v16  ;;  %v521_v49 = vmul.f32 %v498_v34, %v296_v6  ;;  %v523_v51 = vmul.f32 1.442695, %v507_v24  ;;  %v522_v55 = vmul.f32 %v498_v34, %v297_v16  ;;  %v712_v34 = vpop.permute.xlu0 %711 }
 0x1f6   : > { %v525_v57 = vmul.f32 1.442695, %v508_v30  ;;  %v527_v58 = vmul.f32 1.442695, %v509_v31  ;;  %v529_v60 = vmul.f32 1.442695, %v510_v32  ;;  %v588_v0 = vcombine.high %v586_v13, %v586_v13 }
 0x1f7   : > { %1283 = vpow2.f32 %v523_v51  ;;  %v531_v61 = vmul.f32 1.442695, %v511_v33  ;;  %v533_v62 = vmul.f32 1.442695, %v512_v35  ;;  %v535_v1 = vmul.f32 1.442695, %v513_v36 }
 0x1f8   : > { %1285 = vpow2.f32 %v525_v57  ;;  %v537_v2 = vmul.f32 1.442695, %v514_v37  ;;  %v539_v3 = vmul.f32 1.442695, %v515_v38  ;;  %v541_v5 = vmul.f32 1.442695, %v516_v41  ;;  %v716_v41 = vpop.permute.xlu1 %715 }
 0x1f9   : > { %1287 = vpow2.f32 %v527_v58  ;;  %v543_v7 = vmul.f32 1.442695, %v517_v43  ;;  %v545_v8 = vmul.f32 1.442695, %v518_v44  ;;  %v547_v6 = vmul.f32 1.442695, %v519_v47 }
 0x1fa   : > { %1289 = vpow2.f32 %v529_v60  ;;  %v549_v10 = vmul.f32 1.442695, %v520_v48  ;;  %v551_v11 = vmul.f32 1.442695, %v521_v49  ;;  %v602_v16 = vrot.slane %v586_v13, %v1472_v56  ;;  %v1558_v49 = vpop.permute.xlu0 %913  ;;  %v789_v51 = vld [vmem:[#allocation4] sm:$0xff]  ;;  %v790_v57 = vld [vmem:[#allocation4 + $0x8] sm:$0xff] }
 0x1fb   : > { %1291 = vpow2.f32 %v531_v61  ;;  %v609_v17 = vrot.slane %v587_v14, %v1472_v56  ;;  %v616_v18 = vrot.slane %v588_v0, %v1472_v56  ;;  %v553_v20 = vmul.f32 1.442695, %v522_v55 }
 0x1fc   : > { %1293 = vpow2.f32 %v533_v62  ;;  %v617_v22 = vcombine.high %v595_v25, %v595_v25  ;;  %v720_v23 = vrot.slane %v595_v25, %v1445_v9  ;;  %v618_v24 = vcombine.high %v602_v16, %v602_v16  ;;  %v1563_v55 = vpop.permute.xlu1 %917 }
 0x1fd   : > { %1295 = vpow2.f32 %v535_v1  ;;  %v619_v26 = vcombine.high %v609_v17, %v609_v17  ;;  %v620_v27 = vcombine.high %v616_v18, %v616_v18  ;;  %v724_v28 = vrot.slane %v609_v17, %v1445_v9 }
 0x1fe   : > { %1297 = vpow2.f32 %v537_v2  ;;  %v728_v29 = vrot.slane %v617_v22, %v1445_v9  ;;  %v736_v13 = vrot.slane %v602_v16, %v1445_v9  ;;  %v740_v14 = vrot.slane %v616_v18, %v1445_v9 }
 0x1ff   : > { %1299 = vpow2.f32 %v539_v3  ;;  %v732_v56 = vrot.slane %v619_v26, %v1445_v9  ;;  %v744_v30 = vrot.slane %v618_v24, %v1445_v9  ;;  %v748_v25 = vrot.slane %v620_v27, %v1445_v9 }
 0x200   : > { %1301 = vpow2.f32 %v541_v5  ;;  %v757_v31 = vmul.f32 %v720_v23, %v1458_v39  ;;  %v758_v32 = vmul.f32 %v720_v23, %v1462_v42  ;;  %v759_v35 = vmul.f32 %v724_v28, %v1460_v40  ;;  %v1573_v17 = vpop.permute.xlu1 %925 }
 0x201   : > { %v1284_v33 = vpop.eup %1283  ;;  %1303 = vpow2.f32 %v543_v7  ;;  %v760_v36 = vmul.f32 %v724_v28, %v1464_v46  ;;  %v761_v37 = vmul.f32 %v728_v29, %v1466_v50  ;;  %v762_v9 = vmul.f32 %v728_v29, %v1468_v52 }
 0x202   : > { %v1286_v38 = vpop.eup %1285  ;;  %1305 = vpow2.f32 %v545_v8  ;;  %555 = vst.msk [vmem:[#allocation2] sm:$0xff] %vm299_vm3, %v1284_v33  ;;  %v763_v39 = vmul.f32 %v732_v56, %v1474_v59  ;;  %v764_v42 = vmul.f32 %v732_v56, %v1479_v63  ;;  %773 = vst.msk [vmem:[#allocation3] sm:$0xff] %vm299_vm3, %v757_v31  ;;  %v765_v46 = vmul.f32 %v736_v13, %v1495_v15 }
 0x203   : > { %774 = vst.msk [vmem:[#allocation3 + $0x8] sm:$0xff] %vm299_vm3, %v758_v32  ;;  %v1288_v40 = vpop.eup %1287  ;;  %1307 = vpow2.f32 %v547_v6  ;;  %556 = vst.msk [vmem:[#allocation2 + $0x8] sm:$0xff] %vm299_vm3, %v1286_v38  ;;  %v766_v50 = vmul.f32 %v736_v13, %v1502_v21  ;;  %v767_v43 = vmul.f32 %v740_v14, %v1512_v45  ;;  %v768_v59 = vmul.f32 %v740_v14, %v1514_v54 }
 0x204   : > { %775 = vst.msk [vmem:[#allocation3 + $0x10] sm:$0xff] %vm299_vm3, %v759_v35  ;;  %776 = vst.msk [vmem:[#allocation3 + $0x18] sm:$0xff] %vm299_vm3, %v760_v36  ;;  %v1290_v52 = vpop.eup %1289  ;;  %1309 = vpow2.f32 %v549_v10  ;;  %v769_v63 = vmul.f32 %v744_v30, %v700_v12  ;;  %v770_v44 = vmul.f32 %v744_v30, %v704_v19  ;;  %v771_v21 = vmul.f32 %v748_v25, %v712_v34  ;;  %v1570_v10 = vpop.permute.xlu0 %921 }
 0x205   : > { %777 = vst.msk [vmem:[#allocation3 + $0x20] sm:$0xff] %vm299_vm3, %v761_v37  ;;  %557 = vst.msk [vmem:[#allocation2 + $0x10] sm:$0xff] %vm299_vm3, %v1288_v40  ;;  %v1292_v15 = vpop.eup %1291  ;;  %1311 = vpow2.f32 %v551_v11  ;;  %v772_v45 = vmul.f32 %v748_v25, %v716_v41  ;;  %v910_v31 = vpop.permute.xlu1 %909 }
 0x206   : > { %778 = vst.msk [vmem:[#allocation3 + $0x28] sm:$0xff] %vm299_vm3, %v762_v9  ;;  %779 = vst.msk [vmem:[#allocation3 + $0x30] sm:$0xff] %vm299_vm3, %v763_v39  ;;  %v1294_v47 = vpop.eup %1293  ;;  %1313 = vpow2.f32 %v553_v20 }
 0x207   : > { %780 = vst.msk [vmem:[#allocation3 + $0x38] sm:$0xff] %vm299_vm3, %v764_v42  ;;  %558 = vst.msk [vmem:[#allocation2 + $0x18] sm:$0xff] %vm299_vm3, %v1290_v52  ;;  %v1296_v48 = vpop.eup %1295 }
 0x208   : > { %781 = vst.msk [vmem:[#allocation3 + $0x40] sm:$0xff] %vm299_vm3, %v765_v46  ;;  %782 = vst.msk [vmem:[#allocation3 + $0x48] sm:$0xff] %vm299_vm3, %v766_v50  ;;  %v1298_v54 = vpop.eup %1297  ;;  %v906_v14 = vpop.permute.xlu0 %905 }
 0x209   : > { %783 = vst.msk [vmem:[#allocation3 + $0x50] sm:$0xff] %vm299_vm3, %v767_v43  ;;  %559 = vst.msk [vmem:[#allocation2 + $0x20] sm:$0xff] %vm299_vm3, %v1292_v15  ;;  %v1300_v58 = vpop.eup %1299  ;;  %v791_v60 = vld [vmem:[#allocation2] sm:$0xff] }
 0x20a   : > { %784 = vst.msk [vmem:[#allocation3 + $0x58] sm:$0xff] %vm299_vm3, %v768_v59  ;;  %785 = vst.msk [vmem:[#allocation3 + $0x60] sm:$0xff] %vm299_vm3, %v769_v63  ;;  %v1302_v61 = vpop.eup %1301  ;;  %v792_v62 = vld [vmem:[#allocation2 + $0x8] sm:$0xff]  ;;  %v793_v0 = vmul.f32 %v791_v60, %v789_v51  ;;  %v795_v3 = vld [vmem:[#allocation3] sm:$0xff]  ;;  %v934_v59 = vpop.permute.xlu1 %933 }
 0x20b   : > { %786 = vst.msk [vmem:[#allocation3 + $0x68] sm:$0xff] %vm299_vm3, %v770_v44  ;;  %560 = vst.msk [vmem:[#allocation2 + $0x28] sm:$0xff] %vm299_vm3, %v1294_v47  ;;  %v1304_v1 = vpop.eup %1303  ;;  %v794_v2 = vmul.f32 %v792_v62, %v790_v57  ;;  %v796_v7 = vld [vmem:[#allocation3 + $0x8] sm:$0xff]  ;;  %v807_v23 = vld [vmem:[#allocation3 + $0x10] sm:$0xff] }
 0x20c   : > { %787 = vst.msk [vmem:[#allocation3 + $0x70] sm:$0xff] %vm299_vm3, %v771_v21  ;;  %788 = vst.msk [vmem:[#allocation3 + $0x78] sm:$0xff] %vm299_vm3, %v772_v45  ;;  %v1306_v5 = vpop.eup %1305  ;;  %v797_v8 = vadd.f32 %v795_v3, %v793_v0  ;;  %v802_v12 = vld [vmem:[#allocation2 + $0x10] sm:$0xff]  ;;  %v808_v26 = vld [vmem:[#allocation3 + $0x18] sm:$0xff]  ;;  %v930_v46 = vpop.permute.xlu0 %929 }
 0x20d   : > { %561 = vst.msk [vmem:[#allocation2 + $0x30] sm:$0xff] %vm299_vm3, %v1296_v48  ;;  %562 = vst.msk [vmem:[#allocation2 + $0x38] sm:$0xff] %vm299_vm3, %v1298_v54  ;;  %v1308_v6 = vpop.eup %1307  ;;  %v798_v11 = vadd.f32 %v796_v7, %v794_v2  ;;  %v819_v25 = vld [vmem:[#allocation3 + $0x20] sm:$0xff]  ;;  %v820_v32 = vld [vmem:[#allocation3 + $0x28] sm:$0xff] }
 0x20e   : > { %563 = vst.msk [vmem:[#allocation2 + $0x40] sm:$0xff] %vm299_vm3, %v1300_v58  ;;  %564 = vst.msk [vmem:[#allocation2 + $0x48] sm:$0xff] %vm299_vm3, %v1302_v61  ;;  %v1310_v16 = vpop.eup %1309  ;;  %v803_v18 = vld [vmem:[#allocation2 + $0x18] sm:$0xff]  ;;  %v804_v19 = vmul.f32 %v802_v12, %v797_v8  ;;  %v831_v41 = vld [vmem:[#allocation3 + $0x30] sm:$0xff] }
 0x20f   : > { %565 = vst.msk [vmem:[#allocation2 + $0x50] sm:$0xff] %vm299_vm3, %v1304_v1  ;;  %566 = vst.msk [vmem:[#allocation2 + $0x58] sm:$0xff] %vm299_vm3, %v1306_v5  ;;  %v1312_v20 = vpop.eup %1311  ;;  %v805_v22 = vmul.f32 %v803_v18, %v798_v11  ;;  %v832_v9 = vld [vmem:[#allocation3 + $0x38] sm:$0xff]  ;;  %v843_v47 = vld [vmem:[#allocation3 + $0x40] sm:$0xff]  ;;  %v942_v18 = vpop.permute.xlu1 %941 }
 0x210   : > { %567 = vst.msk [vmem:[#allocation2 + $0x60] sm:$0xff] %vm299_vm3, %v1308_v6  ;;  %799 = vst.msk [vmem:[#allocation3] sm:$0xff] %vm299_vm3, %v797_v8  ;;  %v1314_v24 = vpop.eup %1313  ;;  %v809_v27 = vadd.f32 %v807_v23, %v804_v19  ;;  %v814_v29 = vld [vmem:[#allocation2 + $0x20] sm:$0xff]  ;;  %v844_v57 = vld [vmem:[#allocation3 + $0x48] sm:$0xff]  ;;  %v938_v8 = vpop.permute.xlu0 %937 }
 0x211   : > { %568 = vst.msk [vmem:[#allocation2 + $0x68] sm:$0xff] %vm299_vm3, %v1310_v16  ;;  %800 = vst.msk [vmem:[#allocation3 + $0x8] sm:$0xff] %vm299_vm3, %v798_v11  ;;  %v810_v28 = vadd.f32 %v808_v26, %v805_v22  ;;  %v855_v6 = vld [vmem:[#allocation3 + $0x50] sm:$0xff]  ;;  %v856_v19 = vld [vmem:[#allocation3 + $0x58] sm:$0xff] }
 0x212   : > { %569 = vst.msk [vmem:[#allocation2 + $0x70] sm:$0xff] %vm299_vm3, %v1312_v20  ;;  %570 = vst.msk [vmem:[#allocation2 + $0x78] sm:$0xff] %vm299_vm3, %v1314_v24  ;;  %v815_v13 = vld [vmem:[#allocation2 + $0x28] sm:$0xff]  ;;  %v816_v56 = vmul.f32 %v814_v29, %v809_v27 }
 0x213   : > { %811 = vst.msk [vmem:[#allocation3 + $0x10] sm:$0xff] %vm299_vm3, %v809_v27  ;;  %812 = vst.msk [vmem:[#allocation3 + $0x18] sm:$0xff] %vm299_vm3, %v810_v28  ;;  %v817_v30 = vmul.f32 %v815_v13, %v810_v28 }
 0x214   : > { %v821_v33 = vadd.f32 %v819_v25, %v816_v56  ;;  %v826_v35 = vld [vmem:[#allocation2 + $0x30] sm:$0xff]  ;;  %v827_v36 = vld [vmem:[#allocation2 + $0x38] sm:$0xff] }
 0x215   : > { %v822_v34 = vadd.f32 %v820_v32, %v817_v30  ;;  %v838_v43 = vld [vmem:[#allocation2 + $0x40] sm:$0xff]  ;;  %v839_v63 = vld [vmem:[#allocation2 + $0x48] sm:$0xff] }
 0x216   : > { %823 = vst.msk [vmem:[#allocation3 + $0x20] sm:$0xff] %vm299_vm3, %v821_v33  ;;  %v828_v37 = vmul.f32 %v826_v35, %v821_v33  ;;  %v850_v62 = vld [vmem:[#allocation2 + $0x50] sm:$0xff]  ;;  %v867_v30 = vld [vmem:[#allocation3 + $0x60] sm:$0xff]  ;;  %v868_v32 = vld [vmem:[#allocation3 + $0x68] sm:$0xff]  ;;  %v946_v35 = vpop.permute.xlu0 %945 }
 0x217   : > { %824 = vst.msk [vmem:[#allocation3 + $0x28] sm:$0xff] %vm299_vm3, %v822_v34  ;;  %v829_v38 = vmul.f32 %v827_v36, %v822_v34  ;;  %v887_v42 = vld [vmem:[#allocation3] sm:$0xff] }
 0x218   : > { %v833_v39 = vadd.f32 %v831_v41, %v828_v37  ;;  %v888_v40 = vld [vmem:[#allocation3 + $0x8] sm:$0xff]  ;;  %v967_v48 = vmul.f32 %v906_v14, %v887_v42  ;;  %v862_v24 = vld [vmem:[#allocation2 + $0x60] sm:$0xff]  ;;  %v950_v42 = vpop.permute.xlu1 %949 }
 0x219   : > { %v834_v50 = vadd.f32 %v832_v9, %v829_v38  ;;  %v968_v51 = vmul.f32 %v910_v31, %v888_v40  ;;  %v863_v28 = vld [vmem:[#allocation2 + $0x68] sm:$0xff]  ;;  %v874_v37 = vld [vmem:[#allocation2 + $0x70] sm:$0xff]  ;;  %v875_v40 = vld [vmem:[#allocation2 + $0x78] sm:$0xff] }
 0x21a   : > { %v889_v52 = vld [vmem:[#allocation3 + $0x10] sm:$0xff]  ;;  %835 = vst.msk [vmem:[#allocation3 + $0x30] sm:$0xff] %vm299_vm3, %v833_v39  ;;  %v840_v44 = vmul.f32 %v838_v43, %v833_v39  ;;  %v890_v15 = vld [vmem:[#allocation3 + $0x18] sm:$0xff]  ;;  %v983_v12 = vsel %vm299_vm3, %v967_v48, 0.0 }
 0x21b   : > { %v969_v21 = vmul.f32 %v1558_v49, %v889_v52  ;;  %836 = vst.msk [vmem:[#allocation3 + $0x38] sm:$0xff] %vm299_vm3, %v834_v50  ;;  %v841_v45 = vmul.f32 %v839_v63, %v834_v50  ;;  %v970_v54 = vmul.f32 %v1563_v55, %v890_v15  ;;  %v851_v49 = vld [vmem:[#allocation2 + $0x58] sm:$0xff]  ;;  %v984_v16 = vsel %vm299_vm3, %v968_v51, 0.0  ;;  %v879_v63 = vld [vmem:[#allocation3 + $0x70] sm:$0xff] }
 0x21c   : > { %v845_v58 = vadd.f32 %v843_v47, %v840_v44  ;;  %v985_v56 = vadd.f32 %v984_v16, %v983_v12 }
 0x21d   : > { %v992_v60 = vsel %vm299_vm3, %v969_v21, 0.0  ;;  %v846_v61 = vadd.f32 %v844_v57, %v841_v45  ;;  %v891_v0 = vld [vmem:[#allocation3 + $0x20] sm:$0xff]  ;;  %v993_v1 = vsel %vm299_vm3, %v970_v54, 0.0  ;;  %v880_v45 = vld [vmem:[#allocation3 + $0x78] sm:$0xff] }
 0x21e   : > { %847 = vst.msk [vmem:[#allocation3 + $0x40] sm:$0xff] %vm299_vm3, %v845_v58  ;;  %v852_v2 = vmul.f32 %v850_v62, %v845_v58  ;;  %v892_v3 = vld [vmem:[#allocation3 + $0x28] sm:$0xff]  ;;  %v971_v5 = vmul.f32 %v1570_v10, %v891_v0  ;;  %v994_v7 = vadd.f32 %v993_v1, %v992_v60  ;;  %v986_v52 = vrot.slane %v985_v56, 4  ;;  %v954_v1 = vpop.permute.xlu0 %953 }
 0x21f   : > { %848 = vst.msk [vmem:[#allocation3 + $0x48] sm:$0xff] %vm299_vm3, %v846_v61  ;;  %v853_v55 = vmul.f32 %v851_v49, %v846_v61  ;;  %v972_v11 = vmul.f32 %v1573_v17, %v892_v3 }
 0x220   : > { %v857_v20 = vadd.f32 %v855_v6, %v852_v2  ;;  %v1001_v22 = vsel %vm299_vm3, %v971_v5, 0.0  ;;  %v995_v26 = vrot.slane %v994_v7, 4  ;;  %v987_v2 = vadd.f32 %v986_v52, %v985_v56 }
 0x221   : > { %v858_v23 = vadd.f32 %v856_v19, %v853_v55  ;;  %v893_v10 = vld [vmem:[#allocation3 + $0x30] sm:$0xff]  ;;  %v1002_v27 = vsel %vm299_vm3, %v972_v11, 0.0 }
 0x222   : > { %859 = vst.msk [vmem:[#allocation3 + $0x50] sm:$0xff] %vm299_vm3, %v857_v20  ;;  %v864_v29 = vmul.f32 %v862_v24, %v857_v20  ;;  %v894_v17 = vld [vmem:[#allocation3 + $0x38] sm:$0xff]  ;;  %v973_v13 = vmul.f32 %v930_v46, %v893_v10  ;;  %v1003_v31 = vadd.f32 %v1002_v27, %v1001_v22  ;;  %v996_v41 = vadd.f32 %v995_v26, %v994_v7  ;;  %v958_v7 = vpop.permute.xlu1 %957  ;;  %v1216_v26 = vld [vmem:[%s1644_s5] ss:$0 sm:$0xff] }
 0x223   : > { %860 = vst.msk [vmem:[#allocation3 + $0x58] sm:$0xff] %vm299_vm3, %v858_v23  ;;  %v865_v14 = vmul.f32 %v863_v28, %v858_v23  ;;  %v974_v25 = vmul.f32 %v934_v59, %v894_v17  ;;  %v988_v24 = vrot.slane %v987_v2, 2 }
 0x224   : > { %v869_v33 = vadd.f32 %v867_v30, %v864_v29  ;;  %v1010_v34 = vsel %vm299_vm3, %v973_v13, 0.0  ;;  %v1004_v9 = vrot.slane %v1003_v31, 4  ;;  %v997_v57 = vrot.slane %v996_v41, 2  ;;  %v962_v13 = vpop.permute.xlu0 %961 }
 0x225   : > { %v870_v36 = vadd.f32 %v868_v32, %v865_v14  ;;  %v895_v38 = vld [vmem:[#allocation3 + $0x40] sm:$0xff]  ;;  %v1011_v39 = vsel %vm299_vm3, %v974_v25, 0.0 }
 0x226   : > { %871 = vst.msk [vmem:[#allocation3 + $0x60] sm:$0xff] %vm299_vm3, %v869_v33  ;;  %v876_v46 = vmul.f32 %v874_v37, %v869_v33  ;;  %v896_v50 = vld [vmem:[#allocation3 + $0x48] sm:$0xff]  ;;  %v975_v43 = vmul.f32 %v938_v8, %v895_v38  ;;  %v1005_v15 = vadd.f32 %v1004_v9, %v1003_v31  ;;  %v1012_v21 = vadd.f32 %v1011_v39, %v1010_v34  ;;  %v966_v25 = vpop.permute.xlu1 %965 }
 0x227   : > { %872 = vst.msk [vmem:[#allocation3 + $0x68] sm:$0xff] %vm299_vm3, %v870_v36  ;;  %v877_v59 = vmul.f32 %v875_v40, %v870_v36  ;;  %v976_v44 = vmul.f32 %v942_v18, %v896_v50  ;;  %v998_v11 = vadd.f32 %v997_v57, %v996_v41  ;;  %v1061_v36 = vmul.f32 %v1216_v26, %v292_v53 }
 0x228   : > { %v881_v47 = vadd.f32 %v879_v63, %v876_v46  ;;  %v1019_v48 = vsel %vm299_vm3, %v975_v43, 0.0  ;;  %v1013_v58 = vrot.slane %v1012_v21, 4  ;;  %v1006_v3 = vrot.slane %v1005_v15, 2 }
 0x229   : > { %v882_v51 = vadd.f32 %v880_v45, %v877_v59  ;;  %v897_v54 = vld [vmem:[#allocation3 + $0x50] sm:$0xff]  ;;  %v1020_v60 = vsel %vm299_vm3, %v976_v44, 0.0  ;;  %v999_v14 = vrot.slane %v998_v11, 1  ;;  %v989_v38 = vadd.f32 %v988_v24, %v987_v2 }
 0x22a   : > { %883 = vst.msk [vmem:[#allocation3 + $0x70] sm:$0xff] %vm299_vm3, %v881_v47  ;;  %885 = vst.msk [vmem:[#allocation4] sm:$0xff] %vm299_vm3, %v881_v47  ;;  %v898_v61 = vld [vmem:[#allocation3 + $0x58] sm:$0xff]  ;;  %v977_v62 = vmul.f32 %v946_v35, %v897_v54  ;;  %v1021_v0 = vadd.f32 %v1020_v60, %v1019_v48  ;;  %v1014_v5 = vadd.f32 %v1013_v58, %v1012_v21  ;;  %v1063_v46 = vrot.slane %v1061_v36, 1 }
 0x22b   : > { %884 = vst.msk [vmem:[#allocation3 + $0x78] sm:$0xff] %vm299_vm3, %v882_v51  ;;  %886 = vst.msk [vmem:[#allocation4 + $0x8] sm:$0xff] %vm299_vm3, %v882_v51  ;;  %v978_v49 = vmul.f32 %v950_v42, %v898_v61  ;;  %v1007_v10 = vadd.f32 %v1006_v3, %v1005_v15  ;;  %v1000_v52 = vadd.f32 %v999_v14, %v998_v11  ;;  %v1064_v15 = vrot.slane %v1061_v36, 2 }
 0x22c   : > { %v1022_v8 = vrot.slane %v1021_v0, 4  ;;  %v1028_v55 = vsel %vm299_vm3, %v977_v62, 0.0  ;;  %v1015_v12 = vrot.slane %v1014_v5, 2  ;;  %v1065_v21 = vrot.slane %v1061_v36, 3 }
 0x22d   : > { %v899_v6 = vld [vmem:[#allocation3 + $0x60] sm:$0xff]  ;;  %v1029_v16 = vsel %vm299_vm3, %v978_v49, 0.0  ;;  %v1008_v41 = vrot.slane %v1007_v10, 1  ;;  %v990_v4 = vrot.slane %v989_v38, 1  ;;  %v1066_v54 = vrot.slane %v1061_v36, 4 }
 0x22e   : > { %v900_v18 = vld [vmem:[#allocation3 + $0x68] sm:$0xff]  ;;  %v979_v19 = vmul.f32 %v954_v1, %v899_v6  ;;  %v1023_v20 = vadd.f32 %v1022_v8, %v1021_v0  ;;  %v1030_v22 = vadd.f32 %v1029_v16, %v1028_v55  ;;  %v1016_v27 = vadd.f32 %v1015_v12, %v1014_v5 }
 0x22f   : > { %v980_v23 = vmul.f32 %v958_v7, %v900_v18  ;;  %v1009_v53 = vadd.f32 %v1008_v41, %v1007_v10  ;;  %v1067_v57 = vrot.slane %v1061_v36, 5  ;;  %v1079_v0 = vadd.f32 %v1063_v46, %v1000_v52 }
 0x230   : > { %v1024_v28 = vrot.slane %v1023_v20, 2  ;;  %v1031_v29 = vrot.slane %v1030_v22, 4  ;;  %v1037_v17 = vsel %vm299_vm3, %v979_v19, 0.0  ;;  %v1017_v9 = vrot.slane %v1016_v27, 1 }
 0x231   : > { %v901_v56 = vld [vmem:[#allocation3 + $0x70] sm:$0xff]  ;;  %v1038_v30 = vsel %vm299_vm3, %v980_v23, 0.0  ;;  %v1068_v1 = vrot.slane %v1061_v36, 6  ;;  %v1080_v49 = vadd.f32 %v1064_v15, %v1009_v53  ;;  %v991_v2 = vadd.f32 %v990_v4, %v989_v38 }
 0x232   : > { %v902_v31 = vld [vmem:[#allocation3 + $0x78] sm:$0xff]  ;;  %v981_v32 = vmul.f32 %v962_v13, %v901_v56  ;;  %v1025_v33 = vadd.f32 %v1024_v28, %v1023_v20  ;;  %v1032_v34 = vadd.f32 %v1031_v29, %v1030_v22  ;;  %v1039_v35 = vadd.f32 %v1038_v30, %v1037_v17 }
 0x233   : > { %v982_v37 = vmul.f32 %v966_v25, %v902_v31  ;;  %v1018_v45 = vadd.f32 %v1017_v9, %v1016_v27  ;;  %v1094_v12 = vrot.slane %v1079_v0, 7  ;;  %v1069_v16 = vrot.slane %v1061_v36, 7 }
 0x234   : > { %v1033_v39 = vrot.slane %v1032_v34, 2  ;;  %v1040_v42 = vrot.slane %v1039_v35, 4  ;;  %v1046_v40 = vsel %vm299_vm3, %v981_v32, 0.0  ;;  %v1026_v50 = vrot.slane %v1025_v33, 1 }
 0x235   : > { %v1047_v43 = vsel %vm299_vm3, %v982_v37, 0.0  ;;  %v1081_v7 = vadd.f32 %v1065_v21, %v1018_v45  ;;  %v1097_v18 = vrot.slane %v1080_v49, 6  ;;  %v1078_v20 = vadd.f32 %v1061_v36, %v991_v2 }
 0x236   : > { %v1034_v59 = vadd.f32 %v1033_v39, %v1032_v34  ;;  %v1041_v63 = vadd.f32 %v1040_v42, %v1039_v35  ;;  %v1048_v44 = vadd.f32 %v1047_v43, %v1046_v40  ;;  %v1027_v58 = vadd.f32 %v1026_v50, %v1025_v33 }
 0x237   : > { %v1100_v23 = vrot.slane %v1081_v7, 5  ;;  %v1096_v26 = vsel %vm1095_vm8, %v1094_v12, %v1078_v20 }
 0x238   : > { %v1035_v47 = vrot.slane %v1034_v59, 1  ;;  %v1042_v48 = vrot.slane %v1041_v63, 2  ;;  %v1049_v51 = vrot.slane %v1048_v44, 4  ;;  %v1082_v8 = vadd.f32 %v1066_v54, %v1027_v58 }
 0x239   : > { %v1099_v28 = vsel %vm1098_vm9, %v1097_v18, %v1096_v26 }
 0x23a   : > { %v1036_v60 = vadd.f32 %v1035_v47, %v1034_v59  ;;  %v1043_v61 = vadd.f32 %v1042_v48, %v1041_v63  ;;  %v1050_v62 = vadd.f32 %v1049_v51, %v1048_v44  ;;  %v1103_v24 = vrot.slane %v1082_v8, 4 }
 0x23b   : > { %v1102_v13 = vsel %vm1101_vm10, %v1100_v23, %v1099_v28 }
 0x23c   : > { %v1044_v3 = vrot.slane %v1043_v61, 1  ;;  %v1051_v5 = vrot.slane %v1050_v62, 2  ;;  %v1083_v11 = vadd.f32 %v1067_v57, %v1036_v60  ;;  %v1105_v56 = vsel %vm1104_vm11, %v1103_v24, %v1102_v13 }
 0x23e   : > { %v1045_v55 = vadd.f32 %v1044_v3, %v1043_v61  ;;  %v1052_v6 = vadd.f32 %v1051_v5, %v1050_v62  ;;  %v1106_v27 = vrot.slane %v1083_v11, 3 }
 0x240   : > { %v1053_v19 = vrot.slane %v1052_v6, 1  ;;  %v1084_v22 = vadd.f32 %v1068_v1, %v1045_v55  ;;  %v1108_v14 = vsel %vm1107_vm12, %v1106_v27, %v1105_v56 }
 0x242   : > { %v1054_v10 = vadd.f32 %v1053_v19, %v1052_v6  ;;  %v1109_v29 = vrot.slane %v1084_v22, 2 }
 0x244   : > { %v1085_v17 = vadd.f32 %v1069_v16, %v1054_v10  ;;  %v1111_v25 = vsel %vm1110_vm13, %v1109_v29, %v1108_v14 }
 0x246   : > { %v1112_v30 = vrot.slane %v1085_v17, 1 }
 0x248   : > { %v1114_v31 = vsel %vm1113_vm14, %v1112_v30, %v1111_v25 }
 0x249   : > { %1116 = vst.msk [vmem:[%s1430_s14] sm:$0xff] %vm299_vm3, %v1114_v31 }
 0x24a PF: > { %s16_s25 = sadd.s32 1, %s1353_s25   ;;  %s1646_s21 = smov %s1345_s23 }
 0x24b   : > { %p13_p8 = scmp.ge.s32.totalorder %s16_s25, 6   ;;  %s1647_s22 = smov %s1349_s24 }
 0x24c   : > { %s1648_s23 = smov %s1651_s26  ;;  %s1649_s24 = smov %s1655_s27 }
 0x24d   :  { %15 = sbr.rel (!%p13_p8) target bundleno = 3 (0x3), region = 92 }

</bundles_post_ra>
